<compile_context>
chip_gen: v6e
topology: v6e:2x2x1
jax: 0.10.0
libtpu: 0.0.40
codegen_flags: <defaults>
</compile_context>

<pallas_src>
import functools

import jax
import jax.numpy as jnp
from jax.experimental import pallas as pl
from jax.experimental.pallas import tpu as pltpu


def _round_up(x, m):
    return ((x + m - 1) // m) * m


def _tpu_defaults():
    """Per-generation tiling and VMEM-limit defaults (tm is the main perf knob)."""
    vmem_cap = None
    try:
        vmem_cap = int(pltpu.get_tpu_info().vmem_capacity_bytes)
    except Exception:
        pass
    if vmem_cap is None:
        kind = ""
        try:
            kind = jax.devices()[0].device_kind.lower()
        except Exception:
            pass
        vmem_cap = 64 * 1024 * 1024 if "v7" in kind else 128 * 1024 * 1024

    if vmem_cap <= 64 * 1024 * 1024:
        # v7x-class (64 MiB/TC): shrink ti to 256 (still fills the 256-deep MXU K)
        # so tm can stay large enough to be past the compute-bound knee.
        tm, ti = 768, 256
        vmem_limit = max(vmem_cap - 12 * 1024 * 1024, 32 * 1024 * 1024)
    else:
        # v5e / v6e (128 MiB): tm=1024 crosses the ~650 FLOP/B knee for bf16 weights.
        tm, ti = 1024, 512
        vmem_limit = min(vmem_cap - 16 * 1024 * 1024, 112 * 1024 * 1024)
    return tm, ti, vmem_limit


def _fit_tiles(tm, ti, Hp, act_isz, out_isz, w_isz, vmem_limit, weight_buffers):
    """Shrink ti first (free FLOP-wise), then tm, until the tiles fit in VMEM."""
    budget = int(vmem_limit * 0.8)
    wbuf = max(2, weight_buffers)

    def estimate(tm_, ti_):
        return (2 * tm_ * Hp * act_isz          # x tile (double-buffered)
                + 2 * tm_ * Hp * out_isz        # output tile (double-buffered)
                + tm_ * Hp * 4                  # f32 accumulator scratch
                + wbuf * Hp * ti_ * w_isz       # W1 tiles
                + wbuf * ti_ * Hp * w_isz       # W2 tiles
                + 4 * (8 * Hp) * 4)             # biases / gamma / beta slack

    while estimate(tm, ti) > budget and (ti > 256 or tm > 64):
        if ti > 256:
            ti = max(256, ((ti // 2) // 128) * 128)
        else:
            tm = max(64, tm // 2)
    return tm, ti


def ffn_kernel(x_ref, w1_ref, b1_ref, w2_ref, b2_ref, gamma_ref, beta_ref,
               o_ref, acc_ref, *, h_real, h_pad, ti):
    j = pl.program_id(1)

    @pl.when(j == 0)
    def _():
        acc_ref[...] = jnp.zeros_like(acc_ref)

    # first_fc_layer slice + ReLU for this intermediate tile.  Matmul operands stay
    # in their native dtype (bf16 stays bf16 -> MXU peak); accumulate in f32.
    x = x_ref[...]
    h = jnp.dot(x, w1_ref[...], preferred_element_type=jnp.float32)
    b1_tile = b1_ref[:, pl.ds(pl.multiple_of(j * ti, 128), ti)]  # resident b1, no DMA/step
    h = jnp.maximum(h + b1_tile.astype(jnp.float32), 0.0)

    # second_fc_layer partial product, accumulated over I tiles in f32 VMEM scratch.
    acc_ref[...] += jnp.dot(h.astype(w2_ref.dtype), w2_ref[...],
                            preferred_element_type=jnp.float32)

    @pl.when(j == pl.num_programs(1) - 1)
    def _():
        # TODO(synk): dropout is identity (inference/eval mode); training-time masking
        # would use pltpu.prng_seed + pltpu.prng_random_bits on acc before the residual.
        y = (acc_ref[...] + b2_ref[...].astype(jnp.float32)
             + x_ref[...].astype(jnp.float32))

        # LayerNorm over the real hidden columns.  Padded columns of y are exactly
        # zero (x, W2 output cols, b2 all zero-padded), so the sum is exact; the
        # variance needs the padded columns masked after centering.
        inv_h = 1.0 / float(h_real)
        mean = jnp.sum(y, axis=-1, keepdims=True) * inv_h
        centered = y - mean
        if h_pad != h_real:
            mask = (jax.lax.broadcasted_iota(jnp.int32, (1, h_pad), 1)
                    < h_real).astype(jnp.float32)
            centered = centered * mask
        var = jnp.sum(centered * centered, axis=-1, keepdims=True) * inv_h
        y_norm = centered * jax.lax.rsqrt(var + 1e-6)   # eps matches nn.LayerNorm(eps=1e-06)
        out = (y_norm * gamma_ref[...].astype(jnp.float32)
               + beta_ref[...].astype(jnp.float32))
        o_ref[...] = out.astype(o_ref.dtype)


def positionwise_ffn(x, w1, b1, w2, b2, gamma, beta, *,
                     tm=None, ti=None, vmem_limit_bytes=None,
                     weight_buffers=2, compute_dtype=None):
    """x: [B, S, H] -> [B, S, H].  Weights are [in, out] layout.

    tm:              token tile (primary perf knob; weight-stream intensity ~ 2*tm/itemsize).
    ti:              intermediate-dim tile (K of the second matmul).
    weight_buffers:  set to 3 on v6e if the weight DMA is still exposed after raising tm.
    compute_dtype:   e.g. jnp.bfloat16 on v5e when parameters arrive as f32.
    """
    B, S, H = x.shape
    I = w1.shape[1]
    tokens = B * S

    d_tm, d_ti, d_vmem = _tpu_defaults()
    if tm is None:
        tm = d_tm
    if ti is None:
        ti = d_ti
    if vmem_limit_bytes is None:
        vmem_limit_bytes = d_vmem

    out_dtype = x.dtype
    if compute_dtype is not None:
        x = x.astype(compute_dtype)
        w1 = w1.astype(compute_dtype)
        w2 = w2.astype(compute_dtype)

    # Lane-dense / MXU-friendly padded shapes.
    Hp = _round_up(H, 128)
    Ip0 = _round_up(I, 128)
    ti = min(ti, Ip0)                       # both multiples of 128 -> ti stays so
    tm = min(tm, _round_up(tokens, 8))

    act_isz = jnp.dtype(x.dtype).itemsize
    w_isz = jnp.dtype(w1.dtype).itemsize
    out_isz = jnp.dtype(out_dtype).itemsize
    tm, ti = _fit_tiles(tm, ti, Hp, act_isz, out_isz, w_isz,
                        vmem_limit_bytes, weight_buffers)

    Ip = _round_up(Ip0, ti)                 # no ti=128 fallback: zero-pad I instead
    Tp = _round_up(tokens, tm)

    def _pad2d(a, r, c):
        if a.shape == (r, c):
            return a                        # fast path: no wrapper pad round-trip
        return jnp.pad(a, ((0, r - a.shape[0]), (0, c - a.shape[1])))

    x2d = _pad2d(x.reshape(tokens, H), Tp, Hp)
    w1p = _pad2d(w1, Hp, Ip)
    b1p = _pad2d(b1.reshape(1, I), 1, Ip)
    w2p = _pad2d(w2, Ip, Hp)
    b2p = _pad2d(b2.reshape(1, H), 1, Hp)
    gammap = _pad2d(gamma.reshape(1, H), 1, Hp)
    betap = _pad2d(beta.reshape(1, H), 1, Hp)

    grid = (Tp // tm, Ip // ti)
    num_token_tiles = grid[0]

    # Weights are re-streamed once per token tile -> count them that many times.
    cost = pl.CostEstimate(
        flops=4 * Tp * Hp * Ip,
        transcendentals=Tp,
        bytes_accessed=(x2d.size * act_isz
                        + Tp * Hp * out_isz
                        + num_token_tiles * (w1p.size + w2p.size) * w_isz),
    )

    if weight_buffers > 2:
        w1_spec = pl.BlockSpec((Hp, ti), lambda i, j: (0, j),
                               pipeline_mode=pl.Buffered(weight_buffers))
        w2_spec = pl.BlockSpec((ti, Hp), lambda i, j: (j, 0),
                               pipeline_mode=pl.Buffered(weight_buffers))
    else:
        w1_spec = pl.BlockSpec((Hp, ti), lambda i, j: (0, j))
        w2_spec = pl.BlockSpec((ti, Hp), lambda i, j: (j, 0))

    kernel = functools.partial(ffn_kernel, h_real=H, h_pad=Hp, ti=ti)

    out2d = pl.pallas_call(
        kernel,
        out_shape=jax.ShapeDtypeStruct((Tp, Hp), out_dtype),
        grid_spec=pltpu.PrefetchScalarGridSpec(
            num_scalar_prefetch=0,
            grid=grid,
            in_specs=[
                pl.BlockSpec((tm, Hp), lambda i, j: (i, 0)),   # x tile (resident over j)
                w1_spec,                                       # W1 I-tile (streamed)
                pl.BlockSpec((1, Ip), lambda i, j: (0, 0)),    # b1 fully resident
                w2_spec,                                       # W2 I-tile (streamed)
                pl.BlockSpec((1, Hp), lambda i, j: (0, 0)),    # b2
                pl.BlockSpec((1, Hp), lambda i, j: (0, 0)),    # layernorm gamma
                pl.BlockSpec((1, Hp), lambda i, j: (0, 0)),    # layernorm beta
            ],
            out_specs=pl.BlockSpec((tm, Hp), lambda i, j: (i, 0)),
            scratch_shapes=[pltpu.VMEM((tm, Hp), jnp.float32)],
        ),
        compiler_params=pltpu.CompilerParams(
            dimension_semantics=("parallel", "arbitrary"),
            vmem_limit_bytes=int(vmem_limit_bytes),
        ),
        cost_estimate=cost,
    )(x2d, w1p, b1p, w2p, b2p, gammap, betap)

    if (Tp, Hp) != (tokens, H):
        out2d = out2d[:tokens, :H]
    return out2d.reshape(B, S, H)


def reference_ffn(x, w1, b1, w2, b2, gamma, beta):
    h = jnp.maximum(x @ w1 + b1, 0.0)
    y = h @ w2 + b2
    y = y + x
    mean = jnp.mean(y, axis=-1, keepdims=True)
    var = jnp.mean(jnp.square(y - mean), axis=-1, keepdims=True)
    return (y - mean) * jax.lax.rsqrt(var + 1e-6) * gamma + beta


if __name__ == "__main__":
    # Small shapes implied by the module: [batch, seq, hidden_size]
    B, S, H, I = 2, 8, 32, 64
    key = jax.random.PRNGKey(0)
    kx, kw1, kb1, kw2, kb2 = jax.random.split(key, 5)

    x = jax.random.normal(kx, (B, S, H), dtype=jnp.float32)

    # Deterministic parameter init (Linear: [in, out] layout), LayerNorm: ones/zeros.
    w1 = jax.random.normal(kw1, (H, I), dtype=jnp.float32) * (1.0 / jnp.sqrt(H))
    b1 = jax.random.normal(kb1, (I,), dtype=jnp.float32) * 0.01
    w2 = jax.random.normal(kw2, (I, H), dtype=jnp.float32) * (1.0 / jnp.sqrt(I))
    b2 = jax.random.normal(kb2, (H,), dtype=jnp.float32) * 0.01
    gamma = jnp.ones((H,), dtype=jnp.float32)
    beta = jnp.zeros((H,), dtype=jnp.float32)

    out = positionwise_ffn(x, w1, b1, w2, b2, gamma, beta)
    out = jax.block_until_ready(out)

    ref = reference_ffn(x, w1, b1, w2, b2, gamma, beta)
    assert out.shape == (B, S, H)
    assert jnp.allclose(out, ref, atol=1e-4, rtol=1e-4), "mismatch vs reference"

    print("KERNEL_OK")
</pallas_src>

<mosaic_0001>
module attributes {stable_mosaic.version = 11 : i64} {
  func.func @ffn_kernel(%arg0: i32, %arg1: i32, %arg2: memref<16x128xf32, #tpu.memory_space<vmem>>, %arg3: memref<128x128xf32, #tpu.memory_space<vmem>>, %arg4: memref<1x128xf32, #tpu.memory_space<vmem>>, %arg5: memref<128x128xf32, #tpu.memory_space<vmem>>, %arg6: memref<1x128xf32, #tpu.memory_space<vmem>>, %arg7: memref<1x128xf32, #tpu.memory_space<vmem>>, %arg8: memref<1x128xf32, #tpu.memory_space<vmem>>, %arg9: memref<16x128xf32, #tpu.memory_space<vmem>>, %arg10: memref<16x128xf32, #tpu.memory_space<vmem>>) attributes {dimension_semantics = [#tpu.dimension_semantics<parallel>, #tpu.dimension_semantics<arbitrary>], iteration_bounds = array<i64: 1, 1>, scalar_prefetch = 0 : i64, scratch_operands = 1 : i64, tpu.core_type = #tpu.core_type<tc>, window_params = [{transform_indices = @transform_0, window_bounds = array<i64: 16, 128>}, {transform_indices = @transform_1, window_bounds = array<i64: 128, 128>}, {pipeline_mode = #tpu.pipeline_mode<synchronous>, transform_indices = @transform_2, window_bounds = array<i64: 1, 128>}, {transform_indices = @transform_3, window_bounds = array<i64: 128, 128>}, {pipeline_mode = #tpu.pipeline_mode<synchronous>, transform_indices = @transform_4, window_bounds = array<i64: 1, 128>}, {pipeline_mode = #tpu.pipeline_mode<synchronous>, transform_indices = @transform_5, window_bounds = array<i64: 1, 128>}, {pipeline_mode = #tpu.pipeline_mode<synchronous>, transform_indices = @transform_6, window_bounds = array<i64: 1, 128>}, {transform_indices = @transform_7, window_bounds = array<i64: 16, 128>}]} {
    %c0_i32 = arith.constant 0 : i32
    %0 = arith.cmpi eq, %arg1, %c0_i32 : i32
    %1 = arith.extui %0 : i1 to i32
    %c0_i32_0 = arith.constant 0 : i32
    %2 = arith.cmpi ne, %1, %c0_i32_0 : i32
    scf.if %2 {
      %cst_15 = arith.constant 0.000000e+00 : f32
      %22 = vector.broadcast %cst_15 : f32 to vector<16x128xf32>
      %c0_16 = arith.constant 0 : index
      %c0_17 = arith.constant 0 : index
      %23 = vector.load %arg10[%c0_16, %c0_17] : memref<16x128xf32, #tpu.memory_space<vmem>>, vector<16x128xf32>
      tpu.vector_store %arg10[%c0_16, %c0_17], %22 {strides = array<i32>} : memref<16x128xf32, #tpu.memory_space<vmem>>, vector<16x128xf32>,
    } else {
    }
    %c0 = arith.constant 0 : index
    %c0_1 = arith.constant 0 : index
    %3 = vector.load %arg2[%c0, %c0_1] : memref<16x128xf32, #tpu.memory_space<vmem>>, vector<16x128xf32>
    %c0_2 = arith.constant 0 : index
    %c0_3 = arith.constant 0 : index
    %4 = vector.load %arg3[%c0_2, %c0_3] : memref<128x128xf32, #tpu.memory_space<vmem>>, vector<128x128xf32>
    %cst = arith.constant dense<0.000000e+00> : vector<16x128xf32>
    %5 = tpu.matmul %3, %4, %cst {dimension_numbers = #tpu.dot_dimension_numbers<[1], [0], [0], [1], [0, 0, 1, 1], [], []>} : vector<16x128xf32>, vector<128x128xf32>, vector<16x128xf32> -> vector<16x128xf32>
    %c128_i32 = arith.constant 128 : i32
    %6 = arith.muli %arg1, %c128_i32 : i32
    %7 = tpu.assume_multiple %6, 128 : i32
    %c0_4 = arith.constant 0 : index
    %8 = arith.index_cast %7 : i32 to index
    %9 = vector.load %arg4[%c0_4, %8] : memref<1x128xf32, #tpu.memory_space<vmem>>, vector<1x128xf32>
    %10 = vector.broadcast %9 : vector<1x128xf32> to vector<16x128xf32>
    %11 = arith.addf %5, %10 : vector<16x128xf32>
    %cst_5 = arith.constant 0.000000e+00 : f32
    %12 = vector.broadcast %cst_5 : f32 to vector<16x128xf32>
    %13 = arith.maximumf %11, %12 : vector<16x128xf32>
    %c0_6 = arith.constant 0 : index
    %c0_7 = arith.constant 0 : index
    %14 = vector.load %arg10[%c0_6, %c0_7] : memref<16x128xf32, #tpu.memory_space<vmem>>, vector<16x128xf32>
    %c0_8 = arith.constant 0 : index
    %c0_9 = arith.constant 0 : index
    %15 = vector.load %arg5[%c0_8, %c0_9] : memref<128x128xf32, #tpu.memory_space<vmem>>, vector<128x128xf32>
    %cst_10 = arith.constant dense<0.000000e+00> : vector<16x128xf32>
    %16 = tpu.matmul %13, %15, %cst_10 {dimension_numbers = #tpu.dot_dimension_numbers<[1], [0], [0], [1], [0, 0, 1, 1], [], []>} : vector<16x128xf32>, vector<128x128xf32>, vector<16x128xf32> -> vector<16x128xf32>
    %17 = arith.addf %14, %16 : vector<16x128xf32>
    %c0_11 = arith.constant 0 : index
    %c0_12 = arith.constant 0 : index
    %18 = vector.load %arg10[%c0_11, %c0_12] : memref<16x128xf32, #tpu.memory_space<vmem>>, vector<16x128xf32>
    tpu.vector_store %arg10[%c0_11, %c0_12], %17 {strides = array<i32>} : memref<16x128xf32, #tpu.memory_space<vmem>>, vector<16x128xf32>,
    %c0_i32_13 = arith.constant 0 : i32
    %19 = arith.cmpi eq, %arg1, %c0_i32_13 : i32
    %20 = arith.extui %19 : i1 to i32
    %c0_i32_14 = arith.constant 0 : i32
    %21 = arith.cmpi ne, %20, %c0_i32_14 : i32
    scf.if %21 {
      %c0_15 = arith.constant 0 : index
      %c0_16 = arith.constant 0 : index
      %22 = vector.load %arg10[%c0_15, %c0_16] : memref<16x128xf32, #tpu.memory_space<vmem>>, vector<16x128xf32>
      %c0_17 = arith.constant 0 : index
      %c0_18 = arith.constant 0 : index
      %23 = vector.load %arg6[%c0_17, %c0_18] : memref<1x128xf32, #tpu.memory_space<vmem>>, vector<1x128xf32>
      %24 = vector.broadcast %23 : vector<1x128xf32> to vector<16x128xf32>
      %25 = arith.addf %22, %24 : vector<16x128xf32>
      %c0_19 = arith.constant 0 : index
      %c0_20 = arith.constant 0 : index
      %26 = vector.load %arg2[%c0_19, %c0_20] : memref<16x128xf32, #tpu.memory_space<vmem>>, vector<16x128xf32>
      %27 = arith.addf %25, %26 : vector<16x128xf32>
      %cst_21 = arith.constant dense<0.000000e+00> : vector<16xf32>
      %28 = vector.multi_reduction <add>, %27, %cst_21 [1] : vector<16x128xf32> to vector<16xf32>
      %29 = vector.shape_cast %28 : vector<16xf32> to vector<16x1xf32>
      %cst_22 = arith.constant 3.125000e-02 : f32
      %30 = vector.broadcast %cst_22 : f32 to vector<16x1xf32>
      %31 = arith.mulf %29, %30 : vector<16x1xf32>
      %32 = vector.broadcast %31 : vector<16x1xf32> to vector<16x128xf32>
      %33 = arith.subf %27, %32 : vector<16x128xf32>
      %34 = tpu.iota {dimensions = array<i32: 1>} : vector<1x128xi32>
      %c32_i32 = arith.constant 32 : i32
      %35 = vector.broadcast %c32_i32 : i32 to vector<1x128xi32>
      %36 = arith.cmpi slt, %34, %35 : vector<1x128xi32>
      %37 = arith.extui %36 : vector<1x128xi1> to vector<1x128xi32>
      %38 = arith.sitofp %37 : vector<1x128xi32> to vector<1x128xf32>
      %39 = vector.broadcast %38 : vector<1x128xf32> to vector<16x128xf32>
      %40 = arith.mulf %33, %39 : vector<16x128xf32>
      %41 = arith.mulf %40, %40 : vector<16x128xf32>
      %cst_23 = arith.constant dense<0.000000e+00> : vector<16xf32>
      %42 = vector.multi_reduction <add>, %41, %cst_23 [1] : vector<16x128xf32> to vector<16xf32>
      %43 = vector.shape_cast %42 : vector<16xf32> to vector<16x1xf32>
      %cst_24 = arith.constant 3.125000e-02 : f32
      %44 = vector.broadcast %cst_24 : f32 to vector<16x1xf32>
      %45 = arith.mulf %43, %44 : vector<16x1xf32>
      %cst_25 = arith.constant 9.99999997E-7 : f32
      %46 = vector.broadcast %cst_25 : f32 to vector<16x1xf32>
      %47 = arith.addf %45, %46 : vector<16x1xf32>
      %48 = math.rsqrt %47 : vector<16x1xf32>
      %49 = vector.broadcast %48 : vector<16x1xf32> to vector<16x128xf32>
      %50 = arith.mulf %40, %49 : vector<16x128xf32>
      %c0_26 = arith.constant 0 : index
      %c0_27 = arith.constant 0 : index
      %51 = vector.load %arg7[%c0_26, %c0_27] : memref<1x128xf32, #tpu.memory_space<vmem>>, vector<1x128xf32>
      %52 = vector.broadcast %51 : vector<1x128xf32> to vector<16x128xf32>
      %53 = arith.mulf %50, %52 : vector<16x128xf32>
      %c0_28 = arith.constant 0 : index
      %c0_29 = arith.constant 0 : index
      %54 = vector.load %arg8[%c0_28, %c0_29] : memref<1x128xf32, #tpu.memory_space<vmem>>, vector<1x128xf32>
      %55 = vector.broadcast %54 : vector<1x128xf32> to vector<16x128xf32>
      %56 = arith.addf %53, %55 : vector<16x128xf32>
      %c0_30 = arith.constant 0 : index
      %c0_31 = arith.constant 0 : index
      %57 = vector.load %arg9[%c0_30, %c0_31] : memref<16x128xf32, #tpu.memory_space<vmem>>, vector<16x128xf32>
      tpu.vector_store %arg9[%c0_30, %c0_31], %56 {strides = array<i32>} : memref<16x128xf32, #tpu.memory_space<vmem>>, vector<16x128xf32>,
    } else {
    }
    return
  }
  func.func @transform_0(%arg0: i32, %arg1: i32) -> (i32, i32) {
    %c0_i32 = arith.constant 0 : i32
    %c0_i32_0 = arith.constant 0 : i32
    return %arg0, %c0_i32 : i32, i32
  }
  func.func @transform_1(%arg0: i32, %arg1: i32) -> (i32, i32) {
    %c0_i32 = arith.constant 0 : i32
    %c0_i32_0 = arith.constant 0 : i32
    return %c0_i32, %arg1 : i32, i32
  }
  func.func @transform_2(%arg0: i32, %arg1: i32) -> (i32, i32) {
    %c0_i32 = arith.constant 0 : i32
    %c0_i32_0 = arith.constant 0 : i32
    %c0_i32_1 = arith.constant 0 : i32
    return %c0_i32, %c0_i32_0 : i32, i32
  }
  func.func @transform_3(%arg0: i32, %arg1: i32) -> (i32, i32) {
    %c0_i32 = arith.constant 0 : i32
    %c0_i32_0 = arith.constant 0 : i32
    return %arg1, %c0_i32 : i32, i32
  }
  func.func @transform_4(%arg0: i32, %arg1: i32) -> (i32, i32) {
    %c0_i32 = arith.constant 0 : i32
    %c0_i32_0 = arith.constant 0 : i32
    %c0_i32_1 = arith.constant 0 : i32
    return %c0_i32, %c0_i32_0 : i32, i32
  }
  func.func @transform_5(%arg0: i32, %arg1: i32) -> (i32, i32) {
    %c0_i32 = arith.constant 0 : i32
    %c0_i32_0 = arith.constant 0 : i32
    %c0_i32_1 = arith.constant 0 : i32
    return %c0_i32, %c0_i32_0 : i32, i32
  }
  func.func @transform_6(%arg0: i32, %arg1: i32) -> (i32, i32) {
    %c0_i32 = arith.constant 0 : i32
    %c0_i32_0 = arith.constant 0 : i32
    %c0_i32_1 = arith.constant 0 : i32
    return %c0_i32, %c0_i32_0 : i32, i32
  }
  func.func @transform_7(%arg0: i32, %arg1: i32) -> (i32, i32) {
    %c0_i32 = arith.constant 0 : i32
    %c0_i32_0 = arith.constant 0 : i32
    return %arg0, %c0_i32 : i32, i32
  }
}

</mosaic_0001>

<bundles_post_ra>
// kernel: tpu_custom_call.1
= control target key start
LH: loop header
LB: loop body
LE: loop exit
PB: predicated region body
PF: predicated region fallthrough
CT: control target
= control target key end

     0   :  { %12 = vsyncpa [#allocation4], 0  ;;  %s658_s0 = inlined_call_operand.hbm [shape: f32[16,128], index: 0, kind: input, shape index: {}]   ;;  %s659_s1 = inlined_call_operand.hbm [shape: f32[128,128], index: 1, kind: input, shape index: {}]   ;;  %s660_s2 = inlined_call_operand.vmem [shape: f32[1,128], index: 2, kind: input, shape index: {}]   ;;  %s661_s3 = inlined_call_operand.hbm [shape: f32[128,128], index: 3, kind: input, shape index: {}]   ;;  %s662_s4 = inlined_call_operand.vmem [shape: f32[1,128], index: 4, kind: input, shape index: {}]   ;;  %s663_s5 = inlined_call_operand.vmem [shape: f32[1,128], index: 5, kind: input, shape index: {}]   ;;  %s664_s6 = inlined_call_operand.vmem [shape: f32[1,128], index: 6, kind: input, shape index: {}]   ;;  %s665_s7 = inlined_call_operand.hbm [shape: f32[16,128], index: 7, kind: output, shape index: {}]  }
   0x1   :  { %13 = vsyncpa [#allocation7], 0 }
   0x2   :  { %14 = vsyncpa [#allocation5], 0  ;;  %s571_s24 = smov [#allocation6]   ;;  %s572_s26 = smov [#allocation3]  }
   0x3   :  { %s32_s25 = sshll.u32 %s571_s24, 4  ;;  %s20_s27 = sshll.u32 %s572_s26, 4  ;;  %s33_s25 = int_to_ptr.vmem [resolvable:$true] %s32_s25  ;;  %s21_s27 = int_to_ptr.vmem [resolvable:$true] %s20_s27 }
   0x4   :  { %s493_s28 = scalar_lea.vmem %s33_s25, 2048  ;;  %p498_p1 = scmp.lt.s32.totalorder %s33_s25, %s33_s25 }
   0x5   :  { %p494_p0 = scmp.ne.s32.totalorder %s33_s25, %s493_s28  ;;  %p499_p2 = scmp.lt.s32.totalorder %s493_s28, %s493_s28 }
   0x7   :  { %p500_p3 = por %p499_p2, %p498_p1 }
   0x9   :  { %p501_p4 = pnand %p500_p3, %p494_p0 }
   0xb   :  { %504 = shalt.err (!%p501_p4)
}
   0xc   :  { %s573_s29 = smov 128   ;;  %s574_s30 = smov 8  }
   0xd   :  { %38 = dma.hbm_to_vmem [thread:$0]  %s659_s1, 2048, %s33_s25, [#allocation7], %s573_s29, %s573_s29, %s574_s30  }
   0xe   :  { %s513_s10 = scalar_lea.vmem %s21_s27, 256  ;;  %p518_p6 = scmp.lt.s32.totalorder %s21_s27, %s21_s27 }
   0xf   :  { %p514_p5 = scmp.ne.s32.totalorder %s21_s27, %s513_s10  ;;  %p519_p7 = scmp.lt.s32.totalorder %s513_s10, %s513_s10 }
  0x11   :  { %p520_p8 = por %p519_p7, %p518_p6 }
  0x13   :  { %p521_p9 = pnand %p520_p8, %p514_p5 }
  0x15   :  { %524 = shalt.err (!%p521_p9)
}
  0x16   :  { %26 = dma.hbm_to_vmem [thread:$0]  %s658_s0, 256, %s21_s27, [#allocation4], %s573_s29, %s573_s29, %s574_s30  }
  0x17   :  { %s575_s13 = smov [#allocation8]  }
  0x18   :  { %s46_s14 = sshll.u32 %s575_s13, 4  ;;  %s47_s14 = int_to_ptr.vmem [resolvable:$true] %s46_s14 }
  0x19   :  { %s533_s15 = scalar_lea.vmem %s47_s14, 2048  ;;  %p538_p11 = scmp.lt.s32.totalorder %s47_s14, %s47_s14 }
  0x1a   :  { %p534_p10 = scmp.ne.s32.totalorder %s47_s14, %s533_s15  ;;  %p539_p12 = scmp.lt.s32.totalorder %s533_s15, %s533_s15 }
  0x1c   :  { %p540_p13 = por %p539_p12, %p538_p11 }
  0x1e   :  { %p541_p0 = pnand %p540_p13, %p534_p10 }
  0x20   :  { %544 = shalt.err (!%p541_p0)
}
  0x21   :  { %52 = dma.hbm_to_vmem [thread:$0]  %s661_s3, 2048, %s47_s14, [#allocation7], %s573_s29, %s573_s29, %s574_s30  }
  0x22   :  { %565 = dma.done.wait [#allocation4], 256  }
  0x23   :  { %566 = vsyncadd [#allocation4], 4294967040 }
  0x24   :  { %567 = dma.done.wait [#allocation7], 4096  }
  0x25   :  { %568 = vsyncadd [#allocation7], 4294963200  ;;  %v91_v0 = vld [vmem:[#allocation6 + $0x78] sm:$0xff]  ;;  %v90_v1 = vld [vmem:[#allocation6 + $0x70] sm:$0xff]  ;;  %v303_v48 = vlaneseq  ;;  %v576_v52 = vmov 0.0   ;;  %s577_s21 = smov [#allocation9]  }
  0x26   :  { %404 = vmatprep.subr.mxu0 %v91_v0  ;;  %v89_v2 = vld [vmem:[#allocation6 + $0x68] sm:$0xff]  ;;  %v88_v3 = vld [vmem:[#allocation6 + $0x60] sm:$0xff]  ;;  %v636_v4 = vld [vmem:[#allocation3] sm:$0xff]  ;;  %s349_s22 = sshll.u32 %s577_s21, 4  ;;  %s350_s22 = int_to_ptr.vmem [resolvable:$true] %s349_s22 }
  0x27   :  { %405 = vmatpush3.msra.mxu0 %v91_v0  ;;  %v87_v5 = vld [vmem:[#allocation6 + $0x58] sm:$0xff]  ;;  %436 = vmatprep.mubr.f32.mxu0 %v636_v4  ;;  %v196_v7 = vld [vmem:[#allocation8 + $0x70] sm:$0xff]  ;;  %v195_v9 = vld [vmem:[#allocation8 + $0x68] sm:$0xff]  ;;  %v304_v49 = vand.u32 127, %v303_v48  ;;  %s545_s23 = scalar_lea.vmem %s350_s22, 256  ;;  %p550_p2 = scmp.lt.s32.totalorder %s350_s22, %s350_s22 }
  0x28   :  { %406 = vmatprep.subr.mxu0 %v90_v1  ;;  %v197_v6 = vld [vmem:[#allocation8 + $0x78] sm:$0xff]  ;;  %v86_v8 = vld [vmem:[#allocation6 + $0x50] sm:$0xff]  ;;  %v85_v10 = vld [vmem:[#allocation6 + $0x48] sm:$0xff]  ;;  %p546_p1 = scmp.ne.s32.totalorder %s350_s22, %s545_s23  ;;  %p551_p3 = scmp.lt.s32.totalorder %s545_s23, %s545_s23 }
  0x29   :  { %407 = vmatpush3.msra.mxu0 %v90_v1  ;;  %439 = vmatprep.subr.mxu1 %v197_v6  ;;  %v194_v11 = vld [vmem:[#allocation8 + $0x60] sm:$0xff]  ;;  %v193_v13 = vld [vmem:[#allocation8 + $0x58] sm:$0xff]  ;;  %v192_v15 = vld [vmem:[#allocation8 + $0x50] sm:$0xff]  ;;  %vm305_vm0 = vcmp.lt.s32.totalorder %v304_v49, 32 }
  0x2a   :  { %408 = vmatprep.subr.mxu0 %v89_v2  ;;  %440 = vmatpush3.msra.mxu1 %v197_v6  ;;  %v84_v12 = vld [vmem:[#allocation6 + $0x40] sm:$0xff]  ;;  %v83_v14 = vld [vmem:[#allocation6 + $0x38] sm:$0xff]  ;;  %v82_v16 = vld [vmem:[#allocation6 + $0x30] sm:$0xff]  ;;  %v365_v53 = vsel %vm305_vm0, 1.0, %v576_v52  ;;  %p552_p4 = por %p551_p3, %p550_p2 }
  0x2b   :  { %409 = vmatpush3.msra.mxu0 %v89_v2  ;;  %441 = vmatprep.subr.mxu1 %v196_v7  ;;  %v191_v17 = vld [vmem:[#allocation8 + $0x48] sm:$0xff]  ;;  %v190_v19 = vld [vmem:[#allocation8 + $0x40] sm:$0xff]  ;;  %v189_v21 = vld [vmem:[#allocation8 + $0x38] sm:$0xff] }
  0x2c   :  { %410 = vmatprep.subr.mxu0 %v88_v3  ;;  %442 = vmatpush3.msra.mxu1 %v196_v7  ;;  %v81_v18 = vld [vmem:[#allocation6 + $0x28] sm:$0xff]  ;;  %v80_v20 = vld [vmem:[#allocation6 + $0x20] sm:$0xff]  ;;  %v79_v22 = vld [vmem:[#allocation6 + $0x18] sm:$0xff]  ;;  %p553_p5 = pnand %p552_p4, %p546_p1 }
  0x2d   :  { %411 = vmatpush3.msra.mxu0 %v88_v3  ;;  %443 = vmatprep.subr.mxu1 %v195_v9  ;;  %v188_v23 = vld [vmem:[#allocation8 + $0x30] sm:$0xff]  ;;  %v187_v25 = vld [vmem:[#allocation8 + $0x28] sm:$0xff]  ;;  %v186_v27 = vld [vmem:[#allocation8 + $0x20] sm:$0xff] }
  0x2e   :  { %412 = vmatprep.subr.mxu0 %v87_v5  ;;  %444 = vmatpush3.msra.mxu1 %v195_v9  ;;  %v78_v24 = vld [vmem:[#allocation6 + $0x10] sm:$0xff]  ;;  %v77_v26 = vld [vmem:[#allocation6 + $0x8] sm:$0xff]  ;;  %v76_v28 = vld [vmem:[#allocation6] sm:$0xff] }
  0x2f   :  { %413 = vmatpush3.msra.mxu0 %v87_v5  ;;  %445 = vmatprep.subr.mxu1 %v194_v11  ;;  %v75_v29 = vld [vmem:[#allocation3 + $0x8] sm:$0xff]  ;;  %v184_v31 = vld [vmem:[#allocation8 + $0x10] sm:$0xff]  ;;  %v183_v32 = vld [vmem:[#allocation8 + $0x8] sm:$0xff] }
  0x30   :  { %414 = vmatprep.subr.mxu0 %v86_v8  ;;  %446 = vmatpush3.msra.mxu1 %v194_v11  ;;  %v185_v30 = vld [vmem:[#allocation8 + $0x18] sm:$0xff]  ;;  %v182_v33 = vld [vmem:[#allocation8] sm:$0xff]  ;;  %v363_v34 = vld [vmem:[%s660_s2] ss:$0 sm:$0xff] }
  0x31   :  { %415 = vmatpush3.msra.mxu0 %v86_v8  ;;  %447 = vmatprep.subr.mxu1 %v193_v13  ;;  %v364_v42 = vld [vmem:[%s662_s4] ss:$0 sm:$0xff] }
  0x32   :  { %416 = vmatprep.subr.mxu0 %v85_v10  ;;  %448 = vmatpush3.msra.mxu1 %v193_v13  ;;  %v366_v5 = vld [vmem:[%s663_s5] ss:$0 sm:$0xff] }
  0x33   :  { %417 = vmatpush3.msra.mxu0 %v85_v10  ;;  %449 = vmatprep.subr.mxu1 %v192_v15  ;;  %v367_v7 = vld [vmem:[%s664_s6] ss:$0 sm:$0xff] }
  0x34   :  { %418 = vmatprep.subr.mxu0 %v84_v12  ;;  %450 = vmatpush3.msra.mxu1 %v192_v15 }
  0x35   :  { %419 = vmatpush3.msra.mxu0 %v84_v12  ;;  %451 = vmatprep.subr.mxu1 %v191_v17 }
  0x36   :  { %420 = vmatprep.subr.mxu0 %v83_v14  ;;  %452 = vmatpush3.msra.mxu1 %v191_v17 }
  0x37   :  { %421 = vmatpush3.msra.mxu0 %v83_v14  ;;  %453 = vmatprep.subr.mxu1 %v190_v19 }
  0x38   :  { %422 = vmatprep.subr.mxu0 %v82_v16  ;;  %454 = vmatpush3.msra.mxu1 %v190_v19 }
  0x39   :  { %423 = vmatpush3.msra.mxu0 %v82_v16  ;;  %455 = vmatprep.subr.mxu1 %v189_v21 }
  0x3a   :  { %424 = vmatprep.subr.mxu0 %v81_v18  ;;  %456 = vmatpush3.msra.mxu1 %v189_v21 }
  0x3b   :  { %425 = vmatpush3.msra.mxu0 %v81_v18  ;;  %457 = vmatprep.subr.mxu1 %v188_v23 }
  0x3c   :  { %426 = vmatprep.subr.mxu0 %v80_v20  ;;  %458 = vmatpush3.msra.mxu1 %v188_v23 }
  0x3d   :  { %427 = vmatpush3.msra.mxu0 %v80_v20  ;;  %459 = vmatprep.subr.mxu1 %v187_v25 }
  0x3e   :  { %428 = vmatprep.subr.mxu0 %v79_v22  ;;  %460 = vmatpush3.msra.mxu1 %v187_v25 }
  0x3f   :  { %429 = vmatpush3.msra.mxu0 %v79_v22  ;;  %461 = vmatprep.subr.mxu1 %v186_v27 }
  0x40   :  { %430 = vmatprep.subr.mxu0 %v78_v24  ;;  %462 = vmatpush3.msra.mxu1 %v186_v27 }
  0x41   :  { %431 = vmatpush3.msra.mxu0 %v78_v24  ;;  %463 = vmatprep.subr.mxu1 %v185_v30 }
  0x42   :  { %432 = vmatprep.subr.mxu0 %v77_v26  ;;  %464 = vmatpush3.msra.mxu1 %v185_v30 }
  0x43   :  { %433 = vmatpush3.msra.mxu0 %v77_v26  ;;  %465 = vmatprep.subr.mxu1 %v184_v31 }
  0x44   :  { %434 = vmatprep.subr.mxu0 %v76_v28  ;;  %466 = vmatpush3.msra.mxu1 %v184_v31 }
  0x45   :  { %435 = vmatpush3.msra.mxu0 %v76_v28  ;;  %467 = vmatprep.subr.mxu1 %v183_v32 }
  0x46   :  { %437 = vmatmul.mubr.f32.vlgmr.msra.gmra.mxu0 %v75_v29  ;;  %468 = vmatpush3.msra.mxu1 %v183_v32 }
  0x47   :  { %469 = vmatprep.subr.mxu1 %v182_v33 }
  0x48   :  { %470 = vmatpush3.msra.mxu1 %v182_v33 }
 0x106   :  { %v438_v35 = vpop.f32.mrf.mxu0 }
 0x107   :  { %v175_v36 = vadd.f32 %v438_v35, %v363_v34 }
 0x108   :  { %v169_v37 = vpop.f32.mrf.mxu0 }
 0x109   :  { %v170_v38 = vadd.f32 %v363_v34, %v169_v37  ;;  %v179_v40 = vmax.f32 %v175_v36, 0.0 }
 0x10b   :  { %v178_v39 = vmax.f32 %v170_v38, 0.0 }
 0x10d   :  { %471 = vmatprep.mubr.f32.mxu1 %v178_v39 }
 0x10e   :  { %472 = vmatmul.mubr.f32.vlgmr.msra.gmra.mxu1 %v179_v40 }
 0x1ce   :  { %v473_v41 = vpop.f32.mrf.mxu1 }
 0x1cf   :  { %v290_v45 = vadd.f32 %v473_v41, %v364_v42 }
 0x1d0   :  { %v264_v43 = vpop.f32.mrf.mxu1 }
 0x1d1   :  { %v289_v44 = vadd.f32 %v364_v42, %v264_v43  ;;  %v294_v47 = vadd.f32 %v290_v45, %v75_v29 }
 0x1d3   :  { %v293_v46 = vadd.f32 %v289_v44, %v636_v4 }
 0x1d5   :  { %295 = vadd.xlane.f32.xlu0 %v293_v46 }
 0x1d9   :  { %297 = vadd.xlane.f32.xlu0 %v294_v47 }
 0x25e   :  { %v296_v50 = vpop.xlane.xlu0 %295 }
 0x25f   :  { %v299_v51 = vmul.f32 0.03125, %v296_v50 }
 0x261   :  { %v301_v54 = vsub.f32 %v293_v46, %v299_v51 }
 0x262   :  { %v298_v55 = vpop.xlane.xlu0 %297 }
 0x263   :  { %v300_v56 = vmul.f32 0.03125, %v298_v55  ;;  %v308_v57 = vmul.f32 %v365_v53, %v301_v54 }
 0x265   :  { %v302_v58 = vsub.f32 %v294_v47, %v300_v56  ;;  %v310_v59 = vmul.f32 %v308_v57, %v308_v57 }
 0x267   :  { %312 = vadd.xlane.f32.xlu1 %v310_v59  ;;  %v309_v60 = vmul.f32 %v365_v53, %v302_v58 }
 0x269   :  { %v311_v61 = vmul.f32 %v309_v60, %v309_v60 }
 0x26b   :  { %314 = vadd.xlane.f32.xlu1 %v311_v61 }
 0x2f0   :  { %v313_v62 = vpop.xlane.xlu1 %312 }
 0x2f1   :  { %v316_v63 = vmul.f32 0.03125, %v313_v62 }
 0x2f3   :  { %v318_v0 = vadd.f32 1e-06, %v316_v63 }
 0x2f4   :  { %v315_v1 = vpop.xlane.xlu1 %314 }
 0x2f5   :  { %481 = vrsqrt.f32 %v318_v0  ;;  %v317_v2 = vmul.f32 0.03125, %v315_v1 }
 0x2f7   :  { %v319_v3 = vadd.f32 1e-06, %v317_v2 }
 0x2f9   :  { %483 = vrsqrt.f32 %v319_v3 }
 0x302   :  { %v482_v4 = vpop.eup %481 }
 0x303   :  { %v322_v6 = vmul.f32 %v482_v4, %v308_v57 }
 0x305   :  { %v331_v8 = vmul.f32 %v366_v5, %v322_v6 }
 0x306   :  { %v484_v9 = vpop.eup %483 }
 0x307   :  { %v323_v10 = vmul.f32 %v484_v9, %v309_v60  ;;  %v340_v11 = vadd.f32 %v367_v7, %v331_v8 }
 0x309   :  { %v332_v12 = vmul.f32 %v366_v5, %v323_v10  ;;  %342 = vst [vmem:[#allocation9] sm:$0xff] %v340_v11 }
 0x30b   :  { %v341_v13 = vadd.f32 %v367_v7, %v332_v12 }
 0x30d   :  { %343 = vst [vmem:[#allocation9 + $0x8] sm:$0xff] %v341_v13 }
 0x30e   :  { %556 = shalt.err (!%p553_p5)
}
 0x30f   :  { %355 = dma.vmem_to_hbm [thread:$0]  %s350_s22, 256, %s665_s7, [#allocation5], %s573_s29, %s573_s29, %s574_s30  }
 0x310   :  { %569 = dma.done.wait [#allocation5], 256  }
 0x311   :  { %570 = vsyncadd [#allocation5], 4294967040 }
 0x312   :  { %359 = vsyncpa [#allocation4], 1 }
 0x313   :  { %360 = vsyncpa [#allocation7], 1 }
 0x314   :  { %361 = vsyncpa [#allocation5], 1 }

</bundles_post_ra>
